<compile_context>
chip_gen: v7x
topology: tpu7x:2x2x1
jax: 0.10.0
libtpu: 0.0.40
codegen_flags: <defaults>
</compile_context>

<pallas_src>
import functools

import jax
import jax.numpy as jnp
import numpy as np
from jax import lax
from jax.experimental import pallas as pl
from jax.experimental.pallas import tpu as pltpu

EPAD = 128  # lane-padded width of the 2-column label matrix E


def _round_up(x, m):
    return ((x + m - 1) // m) * m


def _vmem_usable():
    """Usable scoped-VMEM budget for the current TPU generation."""
    try:
        cap = int(pltpu.get_tpu_info().vmem_capacity_bytes)
    except Exception:
        cap = 64 << 20  # conservative fallback (v7x per-core VMEM)
    return max(cap - (16 << 20), 32 << 20)


def _pick_tile(n, cap, mult):
    """Largest multiple-of-`mult` divisor of n that is <= cap (n is padded so
    that `mult` always divides it; worst case returns `mult`)."""
    cap = max(int(cap), mult)
    t = (min(cap, n) // mult) * mult
    while t >= mult:
        if n % t == 0:
            return t
        t -= mult
    return mult


# -----------------------------------------------------------------------------
# Kernel A: edge masking + row normalization (memory-bound, row tiled).
# -----------------------------------------------------------------------------
def _mask_kernel(alpha_ref, a_ref, rawmask_ref, amasked_ref, anorm_ref):
    a_masked = a_ref[...] * jax.nn.sigmoid(rawmask_ref[...])
    amasked_ref[...] = a_masked
    row_sums = jnp.sum(a_masked, axis=1, keepdims=True)          # [TM, 1]
    # Fold (1 - alpha) * d_inv into the propagation operand so kernel B's body
    # is just alpha * E + A_norm @ E.
    sdinv = (1.0 - alpha_ref[0]) / jnp.maximum(row_sums, 1e-12)
    anorm_ref[...] = (sdinv * a_masked).astype(anorm_ref.dtype)


# -----------------------------------------------------------------------------
# Kernel B: K-step label propagation + NLL loss.
#   grid = (K, num_row_tiles); K outer (sequential), row tiles inner.
# -----------------------------------------------------------------------------
def _prop_kernel(alpha_ref, a_ref, pos_ref, neg_ref, e_ref, loss_ref, e_scr,
                 *, K, num_tiles, tile_rows, pos_weight, prop_dtype):
    k = pl.program_id(0)          # propagation step
    i = pl.program_id(1)          # row tile
    alpha = alpha_ref[0]
    n_rows = e_scr.shape[1]
    epad = e_scr.shape[2]

    @pl.when(jnp.logical_and(k == 0, i == 0))
    def _init():
        # E0: col 0 = neg indicator, col 1 = pos indicator, rest zero.
        lane = lax.broadcasted_iota(jnp.int32, (n_rows, epad), 1)
        e_scr[0] = (jnp.where(lane == 0, neg_ref[...], 0.0)
                    + jnp.where(lane == 1, pos_ref[...], 0.0))

    src = lax.rem(k, 2)           # ping-pong slot holding step-k input
    dst = 1 - src

    e_all = e_scr[src]                                           # [Np, EPAD]
    if num_tiles == 1:
        e_old = e_all
    else:
        row0 = pl.multiple_of(i * tile_rows, tile_rows)
        e_old = e_scr[src, pl.ds(row0, tile_rows), :]            # [TM, EPAD]

    # MXU matmul in the propagation dtype (bf16 by default), f32 accumulation.
    nE = jnp.dot(a_ref[...], e_all.astype(prop_dtype),
                 preferred_element_type=jnp.float32)             # [TM, EPAD]
    e_next = alpha * e_old + nE

    if num_tiles == 1:
        e_scr[dst] = e_next
    else:
        e_scr[dst, pl.ds(row0, tile_rows), :] = e_next

    # Resident output block: only the final step's E is ever written.
    @pl.when(k == K - 1)
    def _store_e():
        if num_tiles == 1:
            e_ref[...] = e_next
        else:
            e_ref[pl.ds(row0, tile_rows), :] = e_next

    @pl.when(jnp.logical_and(k == K - 1, i == num_tiles - 1))
    def _finalize():
        e_fin = e_scr[dst]                                       # full final E
        pos = pos_ref[...]                                       # [Np, 1]
        neg = neg_ref[...]
        logp = jnp.log(jnp.maximum(e_fin[:, 1:2], 1e-6))
        logn = jnp.log(jnp.maximum(e_fin[:, 0:1], 1e-6))
        pos_sum = jnp.sum(pos * logp, keepdims=True)             # (1, 1)
        neg_sum = jnp.sum(neg * logn, keepdims=True)
        pos_cnt = jnp.sum(pos, keepdims=True)
        neg_cnt = jnp.sum(neg, keepdims=True)
        # NOTE: unguarded division matches torch.mean-over-nonempty semantics;
        # precondition is that both node sets are non-empty.
        loss_ref[...] = pos_weight * (-pos_sum / pos_cnt) + (-neg_sum / neg_cnt)


# -----------------------------------------------------------------------------
# Wrapper
# -----------------------------------------------------------------------------
def label_propagation_loss(a_dense, raw_mask_dense, pos_mask, neg_mask,
                           raw_alpha, *, K=10, pos_weight=1.0,
                           use_bf16_matmul=True, max_rows_override=None):
    """Returns (total_loss, updated_A_dense, E[N, 2]). Mirrors the torch forward.

    a_dense:        [N, N] f32 dense adjacency (with self loops).
    raw_mask_dense: [N, N] f32 raw (pre-sigmoid) per-edge mask values scattered
                    onto the edge positions (off-edge values are irrelevant).
    pos_mask/neg_mask: [N, 1] f32 one-hot indicators of positive/negative nodes.
    raw_alpha:      scalar f32 (pre-sigmoid alpha parameter).
    """
    N = a_dense.shape[0]
    # Pad N to a multiple of 128 so row tiles always exist and lane dims are
    # aligned; padded rows/cols are zero and contribute nothing to the math.
    Np = max(_round_up(N, 128), 128)
    if Np != N:
        p = Np - N
        a_dense = jnp.pad(a_dense, ((0, p), (0, p)))
        raw_mask_dense = jnp.pad(raw_mask_dense, ((0, p), (0, p)))
        pos_mask = jnp.pad(pos_mask, ((0, p), (0, 0)))
        neg_mask = jnp.pad(neg_mask, ((0, p), (0, 0)))

    eff_alpha = jax.nn.sigmoid(raw_alpha).reshape(1).astype(jnp.float32)
    prop_dtype = jnp.bfloat16 if use_bf16_matmul else jnp.float32
    pb = 2 if use_bf16_matmul else 4

    usable = _vmem_usable()          # generation-aware VMEM budget
    budget = usable * 9 // 10        # leave a little slack within the limit

    # ------------------ Kernel A: masking + normalization -------------------
    # Per-row double-buffered footprint: A + raw_mask + A_masked (f32) + A_norm.
    per_row_a = 2 * Np * (4 + 4 + 4 + pb)
    tm_a = _pick_tile(Np, budget // per_row_a, 16)

    a_masked, a_norm = pl.pallas_call(
        _mask_kernel,
        out_shape=(jax.ShapeDtypeStruct((Np, Np), jnp.float32),
                   jax.ShapeDtypeStruct((Np, Np), prop_dtype)),
        grid=(Np // tm_a,),
        in_specs=[
            pl.BlockSpec(memory_space=pltpu.MemorySpace.SMEM),      # alpha
            pl.BlockSpec((tm_a, Np), lambda i: (i, 0)),             # A
            pl.BlockSpec((tm_a, Np), lambda i: (i, 0)),             # raw_mask
        ],
        out_specs=(
            pl.BlockSpec((tm_a, Np), lambda i: (i, 0)),             # A_masked f32
            pl.BlockSpec((tm_a, Np), lambda i: (i, 0)),             # A_norm prop dtype
        ),
        compiler_params=pltpu.CompilerParams(
            dimension_semantics=("parallel",),
            vmem_limit_bytes=usable),
    )(eff_alpha, a_dense, raw_mask_dense)

    # ------------------ Kernel B: propagation + loss ------------------------
    # Fixed VMEM: E ping-pong scratch + resident E output (double buffered)
    # + pos/neg full arrays (double buffered) + slack.
    fixed_b = 4 * Np * EPAD * 4 + 4 * Np * 4 + (64 << 10)
    avail_b = max(budget - fixed_b, 2 * 16 * Np * pb)
    tm_cap = max(avail_b // (2 * Np * pb), 16)
    if max_rows_override is not None:
        tm_cap = min(tm_cap, max_rows_override)
    tm_b = _pick_tile(Np, tm_cap, 16)
    num_tiles = Np // tm_b

    # When A_norm fits VMEM, a constant block index makes it resident: DMA'd
    # exactly once for all K steps.  Otherwise stream row tiles per step.
    a_index_map = (lambda k, i: (0, 0)) if num_tiles == 1 else (lambda k, i: (i, 0))

    kernel = functools.partial(
        _prop_kernel, K=K, num_tiles=num_tiles, tile_rows=tm_b,
        pos_weight=float(pos_weight), prop_dtype=prop_dtype)

    e_pad, loss = pl.pallas_call(
        kernel,
        out_shape=(jax.ShapeDtypeStruct((Np, EPAD), jnp.float32),
                   jax.ShapeDtypeStruct((1, 1), jnp.float32)),
        grid=(K, num_tiles),
        in_specs=[
            pl.BlockSpec(memory_space=pltpu.MemorySpace.SMEM),      # alpha
            pl.BlockSpec((tm_b, Np), a_index_map),                  # A_norm
            pl.BlockSpec((Np, 1), lambda k, i: (0, 0)),             # pos mask (once)
            pl.BlockSpec((Np, 1), lambda k, i: (0, 0)),             # neg mask (once)
        ],
        out_specs=(
            pl.BlockSpec((Np, EPAD), lambda k, i: (0, 0)),          # E (resident)
            pl.BlockSpec((1, 1), lambda k, i: (0, 0)),              # loss
        ),
        scratch_shapes=[
            pltpu.VMEM((2, Np, EPAD), jnp.float32),                 # E ping-pong
        ],
        compiler_params=pltpu.CompilerParams(
            # K must be sequential; row tiles share the E ping-pong scratch, so
            # the row axis is also "arbitrary".
            dimension_semantics=("arbitrary", "arbitrary"),
            vmem_limit_bytes=usable),
    )(eff_alpha, a_norm, pos_mask, neg_mask)

    return loss[0, 0], a_masked[:N, :N], e_pad[:N, :2]


# -----------------------------------------------------------------------------
# References (for validation)
# -----------------------------------------------------------------------------
def _reference_f32(a_dense, raw_mask_dense, pos_mask, neg_mask, raw_alpha, K,
                   pos_weight):
    """Pure-JAX f32 reference reproducing the torch forward semantics."""
    alpha = jax.nn.sigmoid(raw_alpha)
    A = a_dense * jax.nn.sigmoid(raw_mask_dense)
    d_inv = 1.0 / jnp.maximum(A.sum(axis=1, keepdims=True), 1e-12)
    E = jnp.concatenate([neg_mask, pos_mask], axis=1)   # col 0 = neg, col 1 = pos
    for _ in range(K):
        nE = d_inv * (A @ E)
        E = alpha * E + (1.0 - alpha) * nE
    pos_probs = jnp.maximum(E[:, 1:2], 1e-6)
    neg_probs = jnp.maximum(E[:, 0:1], 1e-6)
    pos_loss = -jnp.sum(pos_mask * jnp.log(pos_probs)) / jnp.sum(pos_mask)
    neg_loss = -jnp.sum(neg_mask * jnp.log(neg_probs)) / jnp.sum(neg_mask)
    return pos_weight * pos_loss + neg_loss, A, E


def _reference_matched(a_dense, raw_mask_dense, pos_mask, neg_mask, raw_alpha,
                       K, pos_weight, prop_dtype):
    """Same math with the kernel's folding: A_norm = ((1-a)*d_inv*A) cast to the
    propagation dtype, E = alpha*E + A_norm@E with f32 accumulation."""
    alpha = jax.nn.sigmoid(raw_alpha)
    A = a_dense * jax.nn.sigmoid(raw_mask_dense)
    sdinv = (1.0 - alpha) / jnp.maximum(A.sum(axis=1, keepdims=True), 1e-12)
    A_norm = (sdinv * A).astype(prop_dtype)
    E = jnp.concatenate([neg_mask, pos_mask], axis=1)
    for _ in range(K):
        nE = jnp.dot(A_norm, E.astype(prop_dtype),
                     preferred_element_type=jnp.float32)
        E = alpha * E + nE
    pos_probs = jnp.maximum(E[:, 1:2], 1e-6)
    neg_probs = jnp.maximum(E[:, 0:1], 1e-6)
    pos_loss = -jnp.sum(pos_mask * jnp.log(pos_probs)) / jnp.sum(pos_mask)
    neg_loss = -jnp.sum(neg_mask * jnp.log(neg_probs)) / jnp.sum(neg_mask)
    return pos_weight * pos_loss + neg_loss, A, E


def _make_inputs(key, N, n_pos=8, n_neg=8, p_edge=0.05):
    k1, _ = jax.random.split(key)
    adj = (jax.random.uniform(k1, (N, N)) < p_edge).astype(jnp.float32)
    a_dense = jnp.maximum(adj, jnp.eye(N, dtype=jnp.float32))   # self loops
    raw_mask_dense = a_dense * 1.0    # torch init: raw_mask = ones(nnz)
    pos_mask = jnp.zeros((N, 1), jnp.float32).at[jnp.arange(n_pos), 0].set(1.0)
    neg_mask = jnp.zeros((N, 1), jnp.float32).at[
        jnp.arange(n_pos, n_pos + n_neg), 0].set(1.0)
    return a_dense, raw_mask_dense, pos_mask, neg_mask


if __name__ == "__main__":
    key = jax.random.PRNGKey(0)
    K = 10
    pos_weight = 1.0
    raw_alpha = jnp.float32(0.5)
    k1, k2 = jax.random.split(key)

    # ---- Test 1: N = 128, bf16 propagation, A resident in VMEM -------------
    N1 = 128
    A1, RM1, P1, Q1 = _make_inputs(k1, N1)
    loss1, upA1, E1 = label_propagation_loss(
        A1, RM1, P1, Q1, raw_alpha, K=K, pos_weight=pos_weight,
        use_bf16_matmul=True)
    jax.block_until_ready((loss1, upA1, E1))

    # Tight check against a folding-consistent bf16 reference.
    bl, bA, bE = _reference_matched(A1, RM1, P1, Q1, raw_alpha, K, pos_weight,
                                    jnp.bfloat16)
    np.testing.assert_allclose(np.asarray(loss1), np.asarray(bl), rtol=1e-3, atol=1e-5)
    np.testing.assert_allclose(np.asarray(upA1), np.asarray(bA), rtol=1e-5, atol=1e-6)
    np.testing.assert_allclose(np.asarray(E1), np.asarray(bE), rtol=1e-3, atol=1e-5)

    # Loose sanity check against the pure-f32 (torch-semantics) reference.
    fl, fA, fE = _reference_f32(A1, RM1, P1, Q1, raw_alpha, K, pos_weight)
    np.testing.assert_allclose(np.asarray(loss1), np.asarray(fl), rtol=5e-2, atol=1e-3)
    np.testing.assert_allclose(np.asarray(upA1), np.asarray(fA), rtol=1e-5, atol=1e-6)
    np.testing.assert_allclose(np.asarray(E1), np.asarray(fE), rtol=1e-1, atol=1e-2)

    # ---- Test 2: N = 200 (padding path), f32 matmul, forced streaming ------
    N2 = 200
    A2, RM2, P2, Q2 = _make_inputs(k2, N2)
    loss2, upA2, E2 = label_propagation_loss(
        A2, RM2, P2, Q2, raw_alpha, K=K, pos_weight=pos_weight,
        use_bf16_matmul=False, max_rows_override=128)   # num_tiles = 2
    jax.block_until_ready((loss2, upA2, E2))

    fl2, fA2, fE2 = _reference_f32(A2, RM2, P2, Q2, raw_alpha, K, pos_weight)
    np.testing.assert_allclose(np.asarray(loss2), np.asarray(fl2), rtol=2e-2, atol=1e-3)
    np.testing.assert_allclose(np.asarray(upA2), np.asarray(fA2), rtol=1e-5, atol=1e-6)
    np.testing.assert_allclose(np.asarray(E2), np.asarray(fE2), rtol=5e-2, atol=1e-3)

    print("KERNEL_OK")
</pallas_src>

<mosaic_0001>
module attributes {stable_mosaic.version = 11 : i64} {
  func.func @_mask_kernel(%arg0: i32, %arg1: memref<1xf32, #tpu.memory_space<smem>>, %arg2: memref<128x128xf32, #tpu.memory_space<vmem>>, %arg3: memref<128x128xf32, #tpu.memory_space<vmem>>, %arg4: memref<128x128xf32, #tpu.memory_space<vmem>>, %arg5: memref<128x128xbf16, #tpu.memory_space<vmem>>) attributes {dimension_semantics = [#tpu.dimension_semantics<parallel>], iteration_bounds = array<i64: 1>, scalar_prefetch = 0 : i64, scratch_operands = 0 : i64, tpu.core_type = #tpu.core_type<tc>, window_params = [{transform_indices = @transform_0, window_bounds = array<i64: 1>}, {transform_indices = @transform_1, window_bounds = array<i64: 128, 128>}, {transform_indices = @transform_2, window_bounds = array<i64: 128, 128>}, {transform_indices = @transform_3, window_bounds = array<i64: 128, 128>}, {transform_indices = @transform_4, window_bounds = array<i64: 128, 128>}]} {
    %c0 = arith.constant 0 : index
    %c0_0 = arith.constant 0 : index
    %0 = vector.load %arg2[%c0, %c0_0] : memref<128x128xf32, #tpu.memory_space<vmem>>, vector<128x128xf32>
    %c0_1 = arith.constant 0 : index
    %c0_2 = arith.constant 0 : index
    %1 = vector.load %arg3[%c0_1, %c0_2] : memref<128x128xf32, #tpu.memory_space<vmem>>, vector<128x128xf32>
    %2 = arith.negf %1 : vector<128x128xf32>
    %3 = math.exp %2 : vector<128x128xf32>
    %cst = arith.constant 1.000000e+00 : f32
    %4 = vector.broadcast %cst : f32 to vector<128x128xf32>
    %5 = arith.addf %4, %3 : vector<128x128xf32>
    %6 = arith.divf %4, %5 : vector<128x128xf32>
    %7 = arith.mulf %0, %6 : vector<128x128xf32>
    %c0_3 = arith.constant 0 : index
    %c0_4 = arith.constant 0 : index
    %8 = vector.load %arg4[%c0_3, %c0_4] : memref<128x128xf32, #tpu.memory_space<vmem>>, vector<128x128xf32>
    tpu.vector_store %arg4[%c0_3, %c0_4], %7 {strides = array<i32>} : memref<128x128xf32, #tpu.memory_space<vmem>>, vector<128x128xf32>,
    %cst_5 = arith.constant dense<0.000000e+00> : vector<128xf32>
    %9 = vector.multi_reduction <add>, %7, %cst_5 [1] : vector<128x128xf32> to vector<128xf32>
    %10 = vector.shape_cast %9 : vector<128xf32> to vector<128x1xf32>
    %c0_6 = arith.constant 0 : index
    %11 = memref.load %arg1[%c0_6] : memref<1xf32, #tpu.memory_space<smem>>
    %cst_7 = arith.constant 1.000000e+00 : f32
    %12 = arith.subf %cst_7, %11 : f32
    %cst_8 = arith.constant 9.99999996E-13 : f32
    %13 = vector.broadcast %cst_8 : f32 to vector<128x1xf32>
    %14 = arith.maximumf %10, %13 : vector<128x1xf32>
    %15 = vector.broadcast %12 : f32 to vector<128x1xf32>
    %16 = arith.divf %15, %14 : vector<128x1xf32>
    %17 = vector.broadcast %16 : vector<128x1xf32> to vector<128x128xf32>
    %18 = arith.mulf %17, %7 : vector<128x128xf32>
    %19 = arith.truncf %18 : vector<128x128xf32> to vector<128x128xbf16>
    %c0_9 = arith.constant 0 : index
    %c0_10 = arith.constant 0 : index
    %20 = vector.load %arg5[%c0_9, %c0_10] : memref<128x128xbf16, #tpu.memory_space<vmem>>, vector<128x128xbf16>
    tpu.vector_store %arg5[%c0_9, %c0_10], %19 {strides = array<i32>} : memref<128x128xbf16, #tpu.memory_space<vmem>>, vector<128x128xbf16>,
    return
  }
  func.func @transform_0(%arg0: i32) -> i32 {
    %c0_i32 = arith.constant 0 : i32
    %c0_i32_0 = arith.constant 0 : i32
    return %c0_i32 : i32
  }
  func.func @transform_1(%arg0: i32) -> (i32, i32) {
    %c0_i32 = arith.constant 0 : i32
    %c0_i32_0 = arith.constant 0 : i32
    return %arg0, %c0_i32 : i32, i32
  }
  func.func @transform_2(%arg0: i32) -> (i32, i32) {
    %c0_i32 = arith.constant 0 : i32
    %c0_i32_0 = arith.constant 0 : i32
    return %arg0, %c0_i32 : i32, i32
  }
  func.func @transform_3(%arg0: i32) -> (i32, i32) {
    %c0_i32 = arith.constant 0 : i32
    %c0_i32_0 = arith.constant 0 : i32
    return %arg0, %c0_i32 : i32, i32
  }
  func.func @transform_4(%arg0: i32) -> (i32, i32) {
    %c0_i32 = arith.constant 0 : i32
    %c0_i32_0 = arith.constant 0 : i32
    return %arg0, %c0_i32 : i32, i32
  }
}

</mosaic_0001>

<bundles_post_ra>
// kernel: tpu_custom_call.1
= control target key start
LH: loop header
LB: loop body
LE: loop exit
PB: predicated region body
PF: predicated region fallthrough
CT: control target
= control target key end

     0   :  { %11 = vsyncpa [#allocation4], 0  ;;  %s906_s0 = inlined_call_operand.<no memory space> [shape: f32[1], index: 0, kind: input, shape index: {}]   ;;  %s907_s1 = inlined_call_operand.hbm [shape: f32[128,128], index: 1, kind: input, shape index: {}]   ;;  %s908_s2 = inlined_call_operand.hbm [shape: f32[128,128], index: 2, kind: input, shape index: {}]   ;;  %s909_s3 = inlined_call_operand.hbm [shape: f32[128,128], index: 3, kind: output, shape index: {0}]   ;;  %s910_s4 = inlined_call_operand.hbm [shape: bf16[128,128], index: 4, kind: output, shape index: {1}]  }
   0x1   :  { %12 = vsyncpa [#allocation7], 0 }
   0x2   :  { %13 = vsyncpa [#allocation5], 0 }
   0x3   :  { %14 = vsyncpa [#allocation10], 0  ;;  %s715_s15 = smov [#allocation3]   ;;  %s619_s19 = scalar_lea.hbm %s907_s1, 2048 }
   0x4   :  { %s22_s16 = sshll.u32 %s715_s15, 4  ;;  %p620_p0 = scmp.ne.s32.totalorder %s907_s1, %s619_s19  ;;  %s23_s16 = int_to_ptr.vmem [resolvable:$true] %s22_s16 }
   0x5   :  { %p623_p1 = scmp.lt.u32.totalorder %s619_s19, %s907_s1 }
   0x7   :  { %p625_p2 = pnand %p623_p1, %p620_p0 }
   0x9   :  { %628 = shalt.err (!%p625_p2)
}
   0xa   :  { %s629_s24 = scalar_lea.vmem %s23_s16, 2048  ;;  %p634_p4 = scmp.lt.s32.totalorder %s23_s16, %s23_s16 }
   0xb   :  { %p630_p3 = scmp.ne.s32.totalorder %s23_s16, %s629_s24  ;;  %p635_p5 = scmp.lt.s32.totalorder %s629_s24, %s629_s24 }
   0xd   :  { %p636_p6 = por %p635_p5, %p634_p4 }
   0xf   :  { %p637_p7 = pnand %p636_p6, %p630_p3 }
  0x11   :  { %640 = shalt.err (!%p637_p7)
}
  0x12   :  { %s716_s25 = smov 128   ;;  %s717_s26 = smov 8  }
  0x13   :  { %28 = dma.hbm_to_vmem [thread:$0]  %s907_s1, 2048, %s23_s16, [#allocation4], %s716_s25, %s716_s25, %s717_s26  }
  0x14   :  { %s718_s29 = smov [#allocation6]   ;;  %s641_s7 = scalar_lea.hbm %s908_s2, 2048 }
  0x15   :  { %s34_s30 = sshll.u32 %s718_s29, 4  ;;  %p642_p8 = scmp.ne.s32.totalorder %s908_s2, %s641_s7  ;;  %s35_s30 = int_to_ptr.vmem [resolvable:$true] %s34_s30 }
  0x16   :  { %p645_p9 = scmp.lt.u32.totalorder %s641_s7, %s908_s2 }
  0x18   :  { %p647_p10 = pnand %p645_p9, %p642_p8 }
  0x1a   :  { %650 = shalt.err (!%p647_p10)
}
  0x1b   :  { %s651_s12 = scalar_lea.vmem %s35_s30, 2048  ;;  %p656_p12 = scmp.lt.s32.totalorder %s35_s30, %s35_s30 }
  0x1c   :  { %p652_p11 = scmp.ne.s32.totalorder %s35_s30, %s651_s12  ;;  %p657_p13 = scmp.lt.s32.totalorder %s651_s12, %s651_s12 }
  0x1e   :  { %p658_p0 = por %p657_p13, %p656_p12 }
  0x20   :  { %p659_p1 = pnand %p658_p0, %p652_p11 }
  0x22   :  { %662 = shalt.err (!%p659_p1)
}
  0x23   :  { %40 = dma.hbm_to_vmem [thread:$0]  %s908_s2, 2048, %s35_s30, [#allocation7], %s716_s25, %s716_s25, %s717_s26  }
  0x24   :  { %707 = dma.done.wait [#allocation4], 2048  }
  0x25   :  { %708 = vsyncadd [#allocation4], 4294965248 }
  0x26   :  { %709 = dma.done.wait [#allocation7], 2048  }
  0x27   :  { %710 = vsyncadd [#allocation7], 4294965248  ;;  %v65_v0 = vld [vmem:[#allocation6 + $0x10] sm:$0xff]  ;;  %v63_v2 = vld [vmem:[#allocation6] sm:$0xff]  ;;  %s719_s2 = smov [#allocation8]  }
  0x28   :  { %v422_v1 = vmul.f32 -1.442695, %v65_v0  ;;  %v66_v3 = vld [vmem:[#allocation6 + $0x18] sm:$0xff]  ;;  %v420_v4 = vmul.f32 -1.442695, %v63_v2  ;;  %v64_v6 = vld [vmem:[#allocation6 + $0x8] sm:$0xff] }
  0x29   :  { %v423_v5 = vmul.f32 -1.442695, %v66_v3  ;;  %v421_v7 = vmul.f32 -1.442695, %v64_v6  ;;  %v68_v8 = vld [vmem:[#allocation6 + $0x28] sm:$0xff]  ;;  %v67_v10 = vld [vmem:[#allocation6 + $0x20] sm:$0xff] }
  0x2a   :  { %523 = vpow2.f32 %v422_v1  ;;  %v425_v9 = vmul.f32 -1.442695, %v68_v8  ;;  %v70_v11 = vld [vmem:[#allocation6 + $0x38] sm:$0xff]  ;;  %v424_v12 = vmul.f32 -1.442695, %v67_v10  ;;  %v69_v14 = vld [vmem:[#allocation6 + $0x30] sm:$0xff] }
  0x2b   :  { %525 = vpow2.f32 %v420_v4  ;;  %v427_v13 = vmul.f32 -1.442695, %v70_v11  ;;  %v426_v15 = vmul.f32 -1.442695, %v69_v14  ;;  %v72_v16 = vld [vmem:[#allocation6 + $0x48] sm:$0xff]  ;;  %v71_v18 = vld [vmem:[#allocation6 + $0x40] sm:$0xff] }
  0x2c   :  { %527 = vpow2.f32 %v423_v5  ;;  %v429_v17 = vmul.f32 -1.442695, %v72_v16  ;;  %v74_v19 = vld [vmem:[#allocation6 + $0x58] sm:$0xff]  ;;  %v428_v20 = vmul.f32 -1.442695, %v71_v18  ;;  %v73_v21 = vld [vmem:[#allocation6 + $0x50] sm:$0xff] }
  0x2d   :  { %529 = vpow2.f32 %v421_v7  ;;  %v431_v22 = vmul.f32 -1.442695, %v74_v19  ;;  %v76_v23 = vld [vmem:[#allocation6 + $0x68] sm:$0xff]  ;;  %v430_v24 = vmul.f32 -1.442695, %v73_v21  ;;  %v75_v45 = vld [vmem:[#allocation6 + $0x60] sm:$0xff] }
  0x2e   :  { %531 = vpow2.f32 %v425_v9  ;;  %v433_v25 = vmul.f32 -1.442695, %v76_v23  ;;  %v78_v48 = vld [vmem:[#allocation6 + $0x78] sm:$0xff]  ;;  %v49_v50 = vld [vmem:[#allocation3 + $0x10] sm:$0xff]  ;;  %v47_v54 = vld [vmem:[#allocation3] sm:$0xff]  ;;  %s391_s14 = sshll.u32 %s719_s2, 4  ;;  %s392_s14 = int_to_ptr.vmem [resolvable:$true] %s391_s14 }
  0x2f   :  { %533 = vpow2.f32 %v424_v12  ;;  %v77_v52 = vld [vmem:[#allocation6 + $0x70] sm:$0xff]  ;;  %v432_v56 = vmul.f32 -1.442695, %v75_v45  ;;  %v50_v58 = vld [vmem:[#allocation3 + $0x18] sm:$0xff]  ;;  %v435_v60 = vmul.f32 -1.442695, %v78_v48  ;;  %p668_p3 = scmp.lt.s32.totalorder %s392_s14, %s392_s14 }
  0x30   :  { %535 = vpow2.f32 %v427_v13  ;;  %v48_v63 = vld [vmem:[#allocation3 + $0x8] sm:$0xff]  ;;  %v434_v0 = vmul.f32 -1.442695, %v77_v52  ;;  %v51_v6 = vld [vmem:[#allocation3 + $0x20] sm:$0xff]  ;;  %v54_v9 = vld [vmem:[#allocation3 + $0x38] sm:$0xff]  ;;  %s663_s15 = scalar_lea.vmem %s392_s14, 2048 }
  0x31   :  { %537 = vpow2.f32 %v426_v15  ;;  %v52_v3 = vld [vmem:[#allocation3 + $0x28] sm:$0xff]  ;;  %v53_v12 = vld [vmem:[#allocation3 + $0x30] sm:$0xff]  ;;  %v55_v18 = vld [vmem:[#allocation3 + $0x40] sm:$0xff]  ;;  %p664_p2 = scmp.ne.s32.totalorder %s392_s14, %s663_s15  ;;  %p669_p4 = scmp.lt.s32.totalorder %s663_s15, %s663_s15 }
  0x32   :  { %539 = vpow2.f32 %v429_v17  ;;  %v56_v15 = vld [vmem:[#allocation3 + $0x48] sm:$0xff]  ;;  %v58_v21 = vld [vmem:[#allocation3 + $0x58] sm:$0xff] }
  0x33   :  { %541 = vpow2.f32 %v428_v20  ;;  %p670_p5 = por %p669_p4, %p668_p3 }
  0x34   :  { %v524_v26 = vpop.eup %523  ;;  %543 = vpow2.f32 %v431_v22 }
  0x35   :  { %v526_v27 = vpop.eup %525  ;;  %v129_v28 = vadd.f32 1.0, %v524_v26  ;;  %545 = vpow2.f32 %v430_v24  ;;  %v57_v24 = vld [vmem:[#allocation3 + $0x50] sm:$0xff]  ;;  %p671_p6 = pnand %p670_p5, %p664_p2 }
  0x36   :  { %v528_v29 = vpop.eup %527  ;;  %v127_v30 = vadd.f32 1.0, %v526_v27  ;;  %547 = vpow2.f32 %v433_v25  ;;  %v60_v27 = vld [vmem:[#allocation3 + $0x68] sm:$0xff] }
  0x37   :  { %v530_v31 = vpop.eup %529  ;;  %549 = vrcp.f32 %v129_v28  ;;  %v130_v32 = vadd.f32 1.0, %v528_v29 }
  0x38   :  { %v532_v33 = vpop.eup %531  ;;  %551 = vrcp.f32 %v127_v30  ;;  %v128_v34 = vadd.f32 1.0, %v530_v31 }
  0x39   :  { %v534_v35 = vpop.eup %533  ;;  %553 = vrcp.f32 %v130_v32  ;;  %v132_v36 = vadd.f32 1.0, %v532_v33 }
  0x3a   :  { %v536_v37 = vpop.eup %535  ;;  %555 = vrcp.f32 %v128_v34  ;;  %v131_v38 = vadd.f32 1.0, %v534_v35 }
  0x3b   :  { %v538_v39 = vpop.eup %537  ;;  %557 = vrcp.f32 %v132_v36  ;;  %v134_v40 = vadd.f32 1.0, %v536_v37 }
  0x3c   :  { %v540_v41 = vpop.eup %539  ;;  %559 = vrcp.f32 %v131_v38  ;;  %v133_v42 = vadd.f32 1.0, %v538_v39  ;;  %v59_v39 = vld [vmem:[#allocation3 + $0x60] sm:$0xff] }
  0x3d   :  { %v542_v43 = vpop.eup %541  ;;  %561 = vrcp.f32 %v134_v40  ;;  %v136_v44 = vadd.f32 1.0, %v540_v41  ;;  %v62_v40 = vld [vmem:[#allocation3 + $0x78] sm:$0xff] }
  0x3e   :  { %v544_v46 = vpop.eup %543  ;;  %563 = vrcp.f32 %v133_v42  ;;  %v135_v47 = vadd.f32 1.0, %v542_v43  ;;  %v61_v42 = vld [vmem:[#allocation3 + $0x70] sm:$0xff] }
  0x3f   :  { %v546_v49 = vpop.eup %545  ;;  %565 = vrcp.f32 %v136_v44  ;;  %v138_v51 = vadd.f32 1.0, %v544_v46 }
  0x40   :  { %v548_v53 = vpop.eup %547  ;;  %567 = vrcp.f32 %v135_v47  ;;  %v137_v55 = vadd.f32 1.0, %v546_v49 }
  0x41   :  { %v550_v57 = vpop.eup %549  ;;  %569 = vrcp.f32 %v138_v51  ;;  %v140_v59 = vadd.f32 1.0, %v548_v53 }
  0x42   :  { %v552_v61 = vpop.eup %551  ;;  %v778_v62 = vmul.f32 %v550_v57, %v49_v50  ;;  %571 = vrcp.f32 %v137_v55 }
  0x43   :  { %v554_v1 = vpop.eup %553  ;;  %v780_v2 = vmul.f32 %v552_v61, %v47_v54  ;;  %573 = vrcp.f32 %v140_v59 }
  0x44   :  { %v556_v4 = vpop.eup %555  ;;  %211 = vadd.xlane.f32.xlu1 %v778_v62  ;;  %193 = vst [vmem:[#allocation8 + $0x10] sm:$0xff] %v778_v62  ;;  %v784_v5 = vmul.f32 %v554_v1, %v50_v58  ;;  %575 = vpow2.f32 %v432_v56 }
  0x45   :  { %v558_v7 = vpop.eup %557  ;;  %207 = vadd.xlane.f32.xlu0 %v780_v2  ;;  %191 = vst [vmem:[#allocation8] sm:$0xff] %v780_v2  ;;  %v788_v8 = vmul.f32 %v556_v4, %v48_v63  ;;  %577 = vpow2.f32 %v435_v60 }
  0x46   :  { %v560_v10 = vpop.eup %559  ;;  %194 = vst [vmem:[#allocation8 + $0x18] sm:$0xff] %v784_v5  ;;  %v791_v11 = vmul.f32 %v558_v7, %v52_v3  ;;  %579 = vpow2.f32 %v434_v0 }
  0x47   :  { %v562_v13 = vpop.eup %561  ;;  %192 = vst [vmem:[#allocation8 + $0x8] sm:$0xff] %v788_v8  ;;  %v794_v14 = vmul.f32 %v560_v10, %v51_v6 }
  0x48   :  { %v564_v16 = vpop.eup %563  ;;  %213 = vadd.xlane.f32.xlu1 %v784_v5  ;;  %196 = vst [vmem:[#allocation8 + $0x28] sm:$0xff] %v791_v11  ;;  %v798_v17 = vmul.f32 %v562_v13, %v54_v9 }
  0x49   :  { %v566_v19 = vpop.eup %565  ;;  %209 = vadd.xlane.f32.xlu0 %v788_v8  ;;  %195 = vst [vmem:[#allocation8 + $0x20] sm:$0xff] %v794_v14  ;;  %v802_v20 = vmul.f32 %v564_v16, %v53_v12 }
  0x4a   :  { %v568_v22 = vpop.eup %567  ;;  %198 = vst [vmem:[#allocation8 + $0x38] sm:$0xff] %v798_v17  ;;  %v805_v23 = vmul.f32 %v566_v19, %v56_v15 }
  0x4b   :  { %v570_v25 = vpop.eup %569  ;;  %197 = vst [vmem:[#allocation8 + $0x30] sm:$0xff] %v802_v20  ;;  %v808_v26 = vmul.f32 %v568_v22, %v55_v18 }
  0x4c   :  { %v572_v28 = vpop.eup %571  ;;  %217 = vadd.xlane.f32.xlu1 %v791_v11  ;;  %200 = vst [vmem:[#allocation8 + $0x48] sm:$0xff] %v805_v23  ;;  %v812_v29 = vmul.f32 %v570_v25, %v58_v21 }
  0x4d   :  { %v574_v30 = vpop.eup %573  ;;  %215 = vadd.xlane.f32.xlu0 %v794_v14  ;;  %199 = vst [vmem:[#allocation8 + $0x40] sm:$0xff] %v808_v26  ;;  %v816_v31 = vmul.f32 %v572_v28, %v57_v24 }
  0x4e   :  { %v576_v32 = vpop.eup %575  ;;  %202 = vst [vmem:[#allocation8 + $0x58] sm:$0xff] %v812_v29  ;;  %v819_v33 = vmul.f32 %v574_v30, %v60_v27 }
  0x4f   :  { %v578_v34 = vpop.eup %577  ;;  %201 = vst [vmem:[#allocation8 + $0x50] sm:$0xff] %v816_v31  ;;  %v139_v35 = vadd.f32 1.0, %v576_v32 }
  0x50   :  { %v580_v36 = vpop.eup %579  ;;  %221 = vadd.xlane.f32.xlu1 %v798_v17  ;;  %204 = vst [vmem:[#allocation8 + $0x68] sm:$0xff] %v819_v33  ;;  %v142_v37 = vadd.f32 1.0, %v578_v34 }
  0x51   :  { %219 = vadd.xlane.f32.xlu0 %v802_v20  ;;  %581 = vrcp.f32 %v139_v35  ;;  %v141_v38 = vadd.f32 1.0, %v580_v36 }
  0x52   :  { %583 = vrcp.f32 %v142_v37 }
  0x53   :  { %585 = vrcp.f32 %v141_v38 }
  0x54   :  { %225 = vadd.xlane.f32.xlu1 %v805_v23 }
  0x55   :  { %223 = vadd.xlane.f32.xlu0 %v808_v26 }
  0x58   :  { %229 = vadd.xlane.f32.xlu1 %v812_v29 }
  0x59   :  { %227 = vadd.xlane.f32.xlu0 %v816_v31 }
  0x5b   :  { %v582_v41 = vpop.eup %581 }
  0x5c   :  { %v584_v43 = vpop.eup %583  ;;  %233 = vadd.xlane.f32.xlu1 %v819_v33  ;;  %v830_v44 = vmul.f32 %v582_v41, %v59_v39 }
  0x5d   :  { %v586_v45 = vpop.eup %585  ;;  %v832_v46 = vmul.f32 %v584_v43, %v62_v40 }
  0x5e   :  { %203 = vst [vmem:[#allocation8 + $0x60] sm:$0xff] %v830_v44  ;;  %231 = vadd.xlane.f32.xlu0 %v830_v44  ;;  %v836_v47 = vmul.f32 %v586_v45, %v61_v42 }
  0x5f   :  { %206 = vst [vmem:[#allocation8 + $0x78] sm:$0xff] %v832_v46 }
  0x60   :  { %237 = vadd.xlane.f32.xlu1 %v832_v46  ;;  %205 = vst [vmem:[#allocation8 + $0x70] sm:$0xff] %v836_v47 }
  0x62   :  { %235 = vadd.xlane.f32.xlu0 %v836_v47 }
  0x63   :  { %674 = shalt.err (!%p671_p6)
}
  0x64   :  { %s675_s18 = scalar_lea.hbm %s909_s3, 2048 }
  0x65   :  { %p676_p7 = scmp.ne.s32.totalorder %s909_s3, %s675_s18  ;;  %p679_p8 = scmp.lt.u32.totalorder %s675_s18, %s909_s3 }
  0x67   :  { %p681_p9 = pnand %p679_p8, %p676_p7 }
  0x69   :  { %684 = shalt.err (!%p681_p9)
}
  0x6a   :  { %397 = dma.vmem_to_hbm [thread:$0]  %s392_s14, 2048, %s909_s3, [#allocation5], %s716_s25, %s716_s25, %s717_s26  }
  0x6b   :  { %s240_s29 = ssub.f32 1.0, %s906_s0  ;;  %s720_s0 = smov [#allocation9]  }
  0x6c   :  { %s403_s3 = sshll.u32 %s720_s0, 4  ;;  %s404_s3 = int_to_ptr.vmem [resolvable:$true] %s403_s3 }
  0x6d   :  { %v860_v63 = vstv %s240_s29  ;;  %s685_s25 = scalar_lea.vmem %s404_s3, 1024  ;;  %p690_p11 = scmp.lt.s32.totalorder %s404_s3, %s404_s3 }
  0x6e   :  { %p686_p10 = scmp.ne.s32.totalorder %s404_s3, %s685_s25  ;;  %p691_p12 = scmp.lt.s32.totalorder %s685_s25, %s685_s25 }
  0x70   :  { %p692_p13 = por %p691_p12, %p690_p11 }
  0x72   :  { %p693_p0 = pnand %p692_p13, %p686_p10 }
  0xd1   :  { %v212_v48 = vpop.xlane.xlu1 %211 }
  0xd2   :  { %v243_v49 = vmax.f32 %v212_v48, 1e-12  ;;  %v208_v50 = vpop.xlane.xlu0 %207 }
  0xd3   :  { %v241_v51 = vmax.f32 %v208_v50, 1e-12 }
  0xd4   :  { %587 = vrcp.f32 %v243_v49 }
  0xd5   :  { %589 = vrcp.f32 %v241_v51  ;;  %v214_v52 = vpop.xlane.xlu1 %213 }
  0xd6   :  { %v244_v53 = vmax.f32 %v214_v52, 1e-12  ;;  %v210_v54 = vpop.xlane.xlu0 %209 }
  0xd7   :  { %v242_v55 = vmax.f32 %v210_v54, 1e-12 }
  0xd8   :  { %591 = vrcp.f32 %v244_v53 }
  0xd9   :  { %593 = vrcp.f32 %v242_v55  ;;  %v218_v56 = vpop.xlane.xlu1 %217 }
  0xda   :  { %v246_v57 = vmax.f32 %v218_v56, 1e-12  ;;  %v216_v58 = vpop.xlane.xlu0 %215 }
  0xdb   :  { %v245_v59 = vmax.f32 %v216_v58, 1e-12 }
  0xdc   :  { %595 = vrcp.f32 %v246_v57 }
  0xdd   :  { %597 = vrcp.f32 %v245_v59  ;;  %v222_v60 = vpop.xlane.xlu1 %221 }
  0xde   :  { %v588_v61 = vpop.eup %587  ;;  %v248_v0 = vmax.f32 %v222_v60, 1e-12  ;;  %v220_v1 = vpop.xlane.xlu0 %219 }
  0xdf   :  { %v590_v3 = vpop.eup %589  ;;  %v247_v4 = vmax.f32 %v220_v1, 1e-12  ;;  %v263_v6 = vmul.f32 %v588_v61, %v860_v63 }
  0xe0   :  { %599 = vrcp.f32 %v248_v0  ;;  %v259_v10 = vmul.f32 %v590_v3, %v860_v63 }
  0xe1   :  { %601 = vrcp.f32 %v247_v4  ;;  %v226_v7 = vpop.xlane.xlu1 %225  ;;  %v292_v21 = vmul.f32 %v263_v6, %v778_v62 }
  0xe2   :  { %v592_v9 = vpop.eup %591  ;;  %v250_v12 = vmax.f32 %v226_v7, 1e-12  ;;  %v224_v13 = vpop.xlane.xlu0 %223  ;;  %v290_v27 = vmul.f32 %v259_v10, %v780_v2 }
  0xe3   :  { %v594_v15 = vpop.eup %593  ;;  %v265_v16 = vmul.f32 %v592_v9, %v860_v63  ;;  %v249_v18 = vmax.f32 %v224_v13, 1e-12 }
  0xe4   :  { %v261_v19 = vmul.f32 %v594_v15, %v860_v63  ;;  %603 = vrcp.f32 %v250_v12 }
  0xe5   :  { %v293_v22 = vmul.f32 %v265_v16, %v784_v5  ;;  %605 = vrcp.f32 %v249_v18  ;;  %v230_v24 = vpop.xlane.xlu1 %229 }
  0xe6   :  { %v596_v25 = vpop.eup %595  ;;  %v291_v28 = vmul.f32 %v261_v19, %v788_v8  ;;  %v252_v30 = vmax.f32 %v230_v24, 1e-12  ;;  %v228_v32 = vpop.xlane.xlu0 %227 }
  0xe7   :  { %v598_v34 = vpop.eup %597  ;;  %v476_v35 = vpack.c.bf16 %v293_v22, %v292_v21  ;;  %v269_v36 = vmul.f32 %v596_v25, %v860_v63  ;;  %v251_v37 = vmax.f32 %v228_v32, 1e-12 }
  0xe8   :  { %v471_v38 = vpack.c.bf16 %v291_v28, %v290_v27  ;;  %v267_v39 = vmul.f32 %v598_v34, %v860_v63  ;;  %607 = vrcp.f32 %v252_v30 }
  0xe9   :  { %508 = vst [vmem:[#allocation9 + $0x8] sm:$0xff] %v476_v35   ;;  %v295_v62 = vmul.f32 %v269_v36, %v791_v11  ;;  %609 = vrcp.f32 %v251_v37  ;;  %v234_v5 = vpop.xlane.xlu1 %233 }
  0xea   :  { %v600_v40 = vpop.eup %599  ;;  %472 = vst [vmem:[#allocation9] sm:$0xff] %v471_v38   ;;  %v294_v2 = vmul.f32 %v267_v39, %v794_v14  ;;  %v254_v8 = vmax.f32 %v234_v5, 1e-12 }
  0xeb   :  { %v602_v41 = vpop.eup %601  ;;  %v273_v42 = vmul.f32 %v600_v40, %v860_v63  ;;  %v232_v43 = vpop.xlane.xlu0 %231 }
  0xec   :  { %v481_v45 = vpack.c.bf16 %v295_v62, %v294_v2  ;;  %v271_v48 = vmul.f32 %v602_v41, %v860_v63  ;;  %611 = vrcp.f32 %v254_v8  ;;  %v253_v49 = vmax.f32 %v232_v43, 1e-12 }
  0xed   :  { %v297_v50 = vmul.f32 %v273_v42, %v798_v17  ;;  %v238_v51 = vpop.xlane.xlu1 %237 }
  0xee   :  { %v604_v11 = vpop.eup %603  ;;  %509 = vst [vmem:[#allocation9 + $0x10] sm:$0xff] %v481_v45   ;;  %v296_v52 = vmul.f32 %v271_v48, %v802_v20  ;;  %613 = vrcp.f32 %v253_v49  ;;  %v256_v53 = vmax.f32 %v238_v51, 1e-12 }
  0xef   :  { %v606_v14 = vpop.eup %605  ;;  %v277_v54 = vmul.f32 %v604_v11, %v860_v63  ;;  %v236_v55 = vpop.xlane.xlu0 %235 }
  0xf0   :  { %v486_v56 = vpack.c.bf16 %v297_v50, %v296_v52  ;;  %v275_v57 = vmul.f32 %v606_v14, %v860_v63  ;;  %615 = vrcp.f32 %v256_v53  ;;  %v255_v58 = vmax.f32 %v236_v55, 1e-12 }
  0xf1   :  { %v299_v59 = vmul.f32 %v277_v54, %v805_v23 }
  0xf2   :  { %v608_v60 = vpop.eup %607  ;;  %510 = vst [vmem:[#allocation9 + $0x18] sm:$0xff] %v486_v56   ;;  %v298_v17 = vmul.f32 %v275_v57, %v808_v26  ;;  %617 = vrcp.f32 %v255_v58 }
  0xf3   :  { %v610_v61 = vpop.eup %609  ;;  %v281_v20 = vmul.f32 %v608_v60, %v860_v63 }
  0xf4   :  { %v491_v0 = vpack.c.bf16 %v299_v59, %v298_v17  ;;  %v279_v1 = vmul.f32 %v610_v61, %v860_v63 }
  0xf5   :  { %v301_v3 = vmul.f32 %v281_v20, %v812_v29 }
  0xf6   :  { %v612_v4 = vpop.eup %611  ;;  %511 = vst [vmem:[#allocation9 + $0x20] sm:$0xff] %v491_v0   ;;  %v300_v6 = vmul.f32 %v279_v1, %v816_v31 }
  0xf7   :  { %v285_v7 = vmul.f32 %v612_v4, %v860_v63 }
  0xf8   :  { %v614_v23 = vpop.eup %613  ;;  %v496_v9 = vpack.c.bf16 %v301_v3, %v300_v6 }
  0xf9   :  { %v303_v10 = vmul.f32 %v285_v7, %v819_v33  ;;  %v283_v26 = vmul.f32 %v614_v23, %v860_v63 }
  0xfa   :  { %v616_v12 = vpop.eup %615  ;;  %512 = vst [vmem:[#allocation9 + $0x28] sm:$0xff] %v496_v9  }
  0xfb   :  { %v302_v13 = vmul.f32 %v283_v26, %v830_v44  ;;  %v289_v15 = vmul.f32 %v616_v12, %v860_v63 }
  0xfc   :  { %v618_v16 = vpop.eup %617 }
  0xfd   :  { %v501_v29 = vpack.c.bf16 %v303_v10, %v302_v13  ;;  %v305_v18 = vmul.f32 %v289_v15, %v832_v46  ;;  %v287_v31 = vmul.f32 %v618_v16, %v860_v63 }
  0xff   :  { %513 = vst [vmem:[#allocation9 + $0x30] sm:$0xff] %v501_v29   ;;  %v304_v19 = vmul.f32 %v287_v31, %v836_v47 }
 0x101   :  { %v506_v33 = vpack.c.bf16 %v305_v18, %v304_v19 }
 0x103   :  { %514 = vst [vmem:[#allocation9 + $0x38] sm:$0xff] %v506_v33  }
 0x104   :  { %696 = shalt.err (!%p693_p0)
}
 0x105   :  { %s697_s5 = scalar_lea.hbm %s910_s4, 1024 }
 0x106   :  { %p698_p1 = scmp.ne.s32.totalorder %s910_s4, %s697_s5  ;;  %p701_p2 = scmp.lt.u32.totalorder %s697_s5, %s910_s4 }
 0x108   :  { %p703_p3 = pnand %p701_p2, %p698_p1 }
 0x10a   :  { %706 = shalt.err (!%p703_p3)
}
 0x10b   :  { %s721_s10 = smov 64   ;;  %s722_s11 = smov 4  }
 0x10c   :  { %409 = dma.vmem_to_hbm [thread:$0]  %s404_s3, 1024, %s910_s4, [#allocation10], %s721_s10, %s721_s10, %s722_s11  }
 0x10d   :  { %711 = dma.done.wait [#allocation5], 2048  }
 0x10e   :  { %712 = vsyncadd [#allocation5], 4294965248 }
 0x10f   :  { %713 = dma.done.wait [#allocation10], 1024  }
 0x110   :  { %714 = vsyncadd [#allocation10], 4294966272 }
 0x111   :  { %416 = vsyncpa [#allocation4], 1 }
 0x112   :  { %417 = vsyncpa [#allocation7], 1 }
 0x113   :  { %418 = vsyncpa [#allocation5], 1 }
 0x114   :  { %419 = vsyncpa [#allocation10], 1 }

</bundles_post_ra>
